<compile_context>
chip_gen: v5e
topology: v5e:2x2
jax: 0.10.0
libtpu: 0.0.40
codegen_flags: <defaults>
</compile_context>

<pallas_src>
import functools

import numpy as np
import jax
import jax.numpy as jnp
from jax import lax
from jax.experimental import pallas as pl
from jax.experimental.pallas import tpu as pltpu

NEG_SLOPE = 0.01  # nn.LeakyReLU default negative_slope


# -----------------------------------------------------------------------------
# Pallas kernel: fused conv (block-Toeplitz matmuls) + bias + activations
# -----------------------------------------------------------------------------
def _conv_kernel(x_ref, w_ref, b_ref, *rest, ntaps, relu, has_res, leaky):
    """One batch element per grid step.

    x_ref : (1, R, K)         row-grouped lane-dense input (K = stride*W*Cin)
    w_ref : (ntaps, K, Nout)  block-Toeplitz weights       (Nout = Wo*Cout)
    b_ref : (1, Nout)         bias, pre-tiled across Wo
    rest  : [res_ref (1, Ho, Nout)], o_ref (1, Ho, Nout)
    """
    if has_res:
        res_ref, o_ref = rest
    else:
        (o_ref,) = rest
    ho = o_ref.shape[1]

    # Register accumulator (no VMEM scratch); 1-3 large-K MXU matmuls.
    acc = jnp.zeros(o_ref.shape[1:], jnp.float32)
    for t in range(ntaps):  # static unroll
        rows = x_ref[0, t:t + ho, :].astype(jnp.float32)          # (Ho, K)
        acc = acc + jnp.dot(rows, w_ref[t].astype(jnp.float32),
                            preferred_element_type=jnp.float32)   # (Ho, Nout)

    acc = acc + b_ref[...].astype(jnp.float32)
    if relu:
        acc = jnp.maximum(acc, 0.0)
    if has_res:
        acc = acc + res_ref[0].astype(jnp.float32)
    if leaky:
        acc = jnp.where(acc >= 0, acc, NEG_SLOPE * acc)
    o_ref[0] = acc.astype(o_ref.dtype)


def _toeplitz_weight(w, W, stride, pad):
    """Torch conv weight (Cout, Cin, kh, kw) -> (ntaps, stride*W*Cin, Wo*Cout).

    Horizontal padding and the column stride are folded into the weight; the kh
    vertical taps are grouped into `ntaps` row-group matmuls (one row-group =
    `stride` consecutive padded rows), so the kernel only needs contiguous
    row slices of the input.
    """
    w = np.asarray(w, np.float32)
    Cout, Cin, kh, kw = w.shape
    g = stride
    Wo = (W + 2 * pad - kw) // stride + 1
    ntaps = (kh - 1) // g + 1
    T = np.zeros((ntaps, g * W * Cin, Wo * Cout), np.float32)
    for dy in range(kh):
        t, r_off = dy // g, dy % g
        for dx in range(kw):
            tap = w[:, :, dy, dx].T                     # (Cin, Cout)
            for wo in range(Wo):
                wi = stride * wo + dx - pad             # unpadded input column
                if 0 <= wi < W:
                    r0 = (r_off * W + wi) * Cin
                    c0 = wo * Cout
                    T[t, r0:r0 + Cin, c0:c0 + Cout] = tap
    return jnp.asarray(T), ntaps, Wo


def conv2d_lane_dense(x_ld, H, W, Cin, w, b, *, stride, pad,
                      relu=False, residual=None, leaky=False):
    """Conv2d(Cin->Cout, kxk, stride, pad) + bias (+ ReLU, + residual add,
    + LeakyReLU) on a lane-dense (N, H, W*Cin) input.
    Returns (out_ld (N, Ho, Wo*Cout), Ho, Wo, Cout)."""
    N = x_ld.shape[0]
    Cout, Cin_w, kh, kw = w.shape
    assert Cin_w == Cin and x_ld.shape == (N, H, W * Cin)
    Ho = (H + 2 * pad - kh) // stride + 1

    T, ntaps, Wo = _toeplitz_weight(w, W, stride, pad)
    Nout = Wo * Cout
    bias = jnp.tile(jnp.asarray(b, jnp.float32), (Wo,)).reshape(1, Nout)

    if pad:
        # TODO(synk): the 2-row vertical zero pad is still an XLA pad in HBM; it
        # could be folded into the kernel with boundary-row masking.
        x_ld = jnp.pad(x_ld, ((0, 0), (pad, pad), (0, 0)))
    Hp = H + 2 * pad
    assert Hp % stride == 0, "stride-2 path requires even (H + 2*pad)"
    R = Hp // stride
    K = stride * W * Cin
    xg = x_ld.reshape(N, R, K)        # group `stride` rows together (free reshape)
    assert R >= Ho + ntaps - 1

    kernel = functools.partial(_conv_kernel, ntaps=ntaps, relu=relu,
                               has_res=residual is not None, leaky=leaky)
    in_specs = [
        pl.BlockSpec((1, R, K), lambda n: (n, 0, 0)),
        pl.BlockSpec((ntaps, K, Nout), lambda n: (0, 0, 0)),   # weights resident
        pl.BlockSpec((1, Nout), lambda n: (0, 0)),
    ]
    inputs = [xg, T, bias]
    if residual is not None:
        assert residual.shape == (N, Ho, Nout)
        in_specs.append(pl.BlockSpec((1, Ho, Nout), lambda n: (n, 0, 0)))
        inputs.append(residual)

    out = pl.pallas_call(
        kernel,
        grid=(N,),
        in_specs=in_specs,
        out_specs=pl.BlockSpec((1, Ho, Nout), lambda n: (n, 0, 0)),
        out_shape=jax.ShapeDtypeStruct((N, Ho, Nout), x_ld.dtype),
        compiler_params=pltpu.CompilerParams(
            dimension_semantics=("parallel",)),
    )(*inputs)
    return out, Ho, Wo, Cout


# -----------------------------------------------------------------------------
# ResBlock (downsample=True) and ImageEncoder forward
# -----------------------------------------------------------------------------
def resblock_down(x_ld, H, W, Cin, p, factor):
    """ResBlock with downsample=True:
       shortcut = Conv1x1(s2); t = ReLU(Conv3x3 s2); t = ReLU(Conv3x3 s1);
       t = t + shortcut; [MaxPool2d(2) if factor==4]; LeakyReLU(t)."""
    c1w, c1b, c2w, c2b, scw, scb = p
    sc, Ho, Wo, Cout = conv2d_lane_dense(x_ld, H, W, Cin, scw, scb,
                                         stride=2, pad=0)
    t, Ho, Wo, Cout = conv2d_lane_dense(x_ld, H, W, Cin, c1w, c1b,
                                        stride=2, pad=1, relu=True)
    if factor == 4:
        t, Ho, Wo, Cout = conv2d_lane_dense(t, Ho, Wo, Cout, c2w, c2b,
                                            stride=1, pad=1, relu=True,
                                            residual=sc, leaky=False)
        # TODO(synk): MaxPool2d(2)+LeakyReLU of the factor==4 branch runs in plain
        # JAX (reduce_window), not as a Pallas kernel (not hit by the test config).
        N = t.shape[0]
        t4 = t.reshape(N, Ho, Wo, Cout)
        t4 = lax.reduce_window(t4, -jnp.inf, lax.max,
                               (1, 2, 2, 1), (1, 2, 2, 1), "VALID")
        t4 = jnp.where(t4 >= 0, t4, NEG_SLOPE * t4)
        Ho, Wo = Ho // 2, Wo // 2
        t = t4.reshape(N, Ho, Wo * Cout)
    else:
        t, Ho, Wo, Cout = conv2d_lane_dense(t, Ho, Wo, Cout, c2w, c2b,
                                            stride=1, pad=1, relu=True,
                                            residual=sc, leaky=True)
    return t, Ho, Wo, Cout


def image_encoder_forward(x_nchw, params, config):
    """Pallas implementation of ImageEncoder.forward; returns the in_feat list
    (NCHW arrays / None), matching the PyTorch module semantics."""
    scale = config["downsample_scale"]
    scale_num = len(scale)
    B, C, H, W = x_nchw.shape

    x_ld = jnp.transpose(x_nchw, (0, 2, 3, 1)).reshape(B, H, W * C)

    # inconv (3x3, s1, p1, no activation); block_rrdb is an empty Sequential.
    iw, ib = params["inconv"]
    cur, Ho, Wo, Cc = conv2d_lane_dense(x_ld, H, W, C, iw, ib, stride=1, pad=1)

    feats = [(cur, Ho, Wo, Cc)]
    for i in range(scale_num - 2):
        cur, Ho, Wo, Cc = resblock_down(cur, Ho, Wo, Cc, params["pre"][i],
                                        factor=scale[i])
        feats.append((cur, Ho, Wo, Cc))
    if scale_num >= 2:
        cur, Ho, Wo, Cc = resblock_down(cur, Ho, Wo, Cc, params["down_high"],
                                        factor=scale[-2])
        feats.append((cur, Ho, Wo, Cc))
    cur, Ho, Wo, Cc = resblock_down(cur, Ho, Wo, Cc, params["down_low"],
                                    factor=scale[-1])
    feats.append((cur, Ho, Wo, Cc))

    in_feat = []
    n_drop = len(feats) - config["scale_in_use"]
    for i, (f, h, w, c) in enumerate(feats):
        if i < n_drop:
            in_feat.append(None)
        else:
            in_feat.append(jnp.transpose(f.reshape(B, h, w, c), (0, 3, 1, 2)))
    return in_feat


# -----------------------------------------------------------------------------
# Pure-JAX reference (mirrors the PyTorch module)
# -----------------------------------------------------------------------------
def _conv_ref(x, w, b, stride, pad):
    y = lax.conv_general_dilated(
        x, jnp.asarray(w), (stride, stride), [(pad, pad), (pad, pad)],
        dimension_numbers=("NCHW", "OIHW", "NCHW"),
        precision=lax.Precision.HIGHEST)
    return y + jnp.asarray(b).reshape(1, -1, 1, 1)


def _resblock_ref(x, p, factor):
    c1w, c1b, c2w, c2b, scw, scb = p
    sc = _conv_ref(x, scw, scb, 2, 0)
    t = jax.nn.relu(_conv_ref(x, c1w, c1b, 2, 1))
    t = jax.nn.relu(_conv_ref(t, c2w, c2b, 1, 1))
    t = t + sc
    if factor == 4:
        t = lax.reduce_window(t, -jnp.inf, lax.max,
                              (1, 1, 2, 2), (1, 1, 2, 2), "VALID")
    return jnp.where(t >= 0, t, NEG_SLOPE * t)


def image_encoder_reference(x, params, config):
    scale = config["downsample_scale"]
    scale_num = len(scale)
    iw, ib = params["inconv"]
    cur = _conv_ref(x, iw, ib, 1, 1)
    feats = [cur]
    for i in range(scale_num - 2):
        cur = _resblock_ref(cur, params["pre"][i], scale[i])
        feats.append(cur)
    if scale_num >= 2:
        cur = _resblock_ref(cur, params["down_high"], scale[-2])
        feats.append(cur)
    cur = _resblock_ref(cur, params["down_low"], scale[-1])
    feats.append(cur)
    n_drop = len(feats) - config["scale_in_use"]
    return [None if i < n_drop else f for i, f in enumerate(feats)]


# -----------------------------------------------------------------------------
# Test
# -----------------------------------------------------------------------------
if __name__ == "__main__":
    config = {
        "base_channel": 8,
        "downsample_scale": [2, 2],   # scale_num = 2
        "n_channel": 3,
        "shuffle_scale": 2,
        "scale_in_use": 2,
    }
    base = config["base_channel"]
    scale = config["downsample_scale"]
    scale_num = len(scale)
    Cin0 = config["n_channel"] * config["shuffle_scale"] ** 2    # 12
    B, H, W = 2, 16, 16

    key = jax.random.PRNGKey(0)
    k_x, k_in, k_pre, k_hi, k_lo = jax.random.split(key, 5)

    def conv_params(k, cout, cin, ksz):
        kw_, kb_ = jax.random.split(k)
        w = 0.1 * jax.random.normal(kw_, (cout, cin, ksz, ksz), jnp.float32)
        b = 0.1 * jax.random.normal(kb_, (cout,), jnp.float32)
        return w, b

    def resblock_params(k, cin, cout):
        k1, k2, k3 = jax.random.split(k, 3)
        c1w, c1b = conv_params(k1, cout, cin, 3)     # conv1 3x3 s2
        c2w, c2b = conv_params(k2, cout, cout, 3)    # conv2 3x3 s1
        scw, scb = conv_params(k3, cout, cin, 1)     # shortcut 1x1 s2
        return (c1w, c1b, c2w, c2b, scw, scb)

    x = jax.random.normal(k_x, (B, Cin0, H, W), jnp.float32)

    params = {"inconv": conv_params(k_in, base, Cin0, 3), "pre": []}
    pre_keys = jax.random.split(k_pre, max(scale_num - 2, 1))
    for i in range(scale_num - 2):
        params["pre"].append(
            resblock_params(pre_keys[i], base * 2 ** i, base * 2 ** (i + 1)))
    params["down_high"] = (resblock_params(k_hi, base * 2 ** (scale_num - 2),
                                           base * 2 ** (scale_num - 1))
                           if scale_num >= 2 else None)
    params["down_low"] = resblock_params(k_lo, base * 2 ** (scale_num - 1),
                                         base * 2 ** scale_num)

    out = image_encoder_forward(x, params, config)
    for o in out:
        if o is not None:
            jax.block_until_ready(o)

    ref = image_encoder_reference(x, params, config)
    assert len(out) == len(ref)
    for o, r in zip(out, ref):
        assert (o is None) == (r is None)
        if o is None:
            continue
        assert o.shape == r.shape, (o.shape, r.shape)
        err = float(jnp.max(jnp.abs(o - r)))
        assert jnp.allclose(o, r, rtol=2e-3, atol=2e-3), f"max abs err {err}"

    print("KERNEL_OK")
</pallas_src>

<mosaic_0001>
module attributes {stable_mosaic.version = 11 : i64} {
  func.func @_conv_kernel(%arg0: i32, %arg1: memref<1x18x192xf32, #tpu.memory_space<vmem>>, %arg2: memref<3x192x128xf32, #tpu.memory_space<vmem>>, %arg3: memref<1x128xf32, #tpu.memory_space<vmem>>, %arg4: memref<1x16x128xf32, #tpu.memory_space<vmem>>) attributes {dimension_semantics = [#tpu.dimension_semantics<parallel>], iteration_bounds = array<i64: 2>, scalar_prefetch = 0 : i64, scratch_operands = 0 : i64, tpu.core_type = #tpu.core_type<tc>, window_params = [{transform_indices = @transform_0, window_bounds = array<i64: 1, 18, 192>}, {pipeline_mode = #tpu.pipeline_mode<synchronous>, transform_indices = @transform_1, window_bounds = array<i64: 3, 192, 128>}, {pipeline_mode = #tpu.pipeline_mode<synchronous>, transform_indices = @transform_2, window_bounds = array<i64: 1, 128>}, {transform_indices = @transform_3, window_bounds = array<i64: 1, 16, 128>}]} {
    %cst = arith.constant 0.000000e+00 : f32
    %0 = vector.broadcast %cst : f32 to vector<16x128xf32>
    %c0 = arith.constant 0 : index
    %c0_0 = arith.constant 0 : index
    %c0_1 = arith.constant 0 : index
    %1 = vector.load %arg1[%c0, %c0_0, %c0_1] : memref<1x18x192xf32, #tpu.memory_space<vmem>>, vector<1x16x192xf32>
    %2 = vector.shape_cast %1 : vector<1x16x192xf32> to vector<16x192xf32>
    %c0_2 = arith.constant 0 : index
    %c0_3 = arith.constant 0 : index
    %c0_4 = arith.constant 0 : index
    %3 = vector.load %arg2[%c0_2, %c0_3, %c0_4] : memref<3x192x128xf32, #tpu.memory_space<vmem>>, vector<1x192x128xf32>
    %4 = vector.shape_cast %3 : vector<1x192x128xf32> to vector<192x128xf32>
    %cst_5 = arith.constant dense<0.000000e+00> : vector<16x128xf32>
    %5 = tpu.matmul %2, %4, %cst_5 {dimension_numbers = #tpu.dot_dimension_numbers<[1], [0], [0], [1], [0, 0, 1, 1], [], []>} : vector<16x192xf32>, vector<192x128xf32>, vector<16x128xf32> -> vector<16x128xf32>
    %6 = arith.addf %0, %5 : vector<16x128xf32>
    %c0_6 = arith.constant 0 : index
    %c1 = arith.constant 1 : index
    %c0_7 = arith.constant 0 : index
    %7 = vector.load %arg1[%c0_6, %c1, %c0_7] : memref<1x18x192xf32, #tpu.memory_space<vmem>>, vector<1x16x192xf32>
    %8 = vector.shape_cast %7 : vector<1x16x192xf32> to vector<16x192xf32>
    %c1_8 = arith.constant 1 : index
    %c0_9 = arith.constant 0 : index
    %c0_10 = arith.constant 0 : index
    %9 = vector.load %arg2[%c1_8, %c0_9, %c0_10] : memref<3x192x128xf32, #tpu.memory_space<vmem>>, vector<1x192x128xf32>
    %10 = vector.shape_cast %9 : vector<1x192x128xf32> to vector<192x128xf32>
    %cst_11 = arith.constant dense<0.000000e+00> : vector<16x128xf32>
    %11 = tpu.matmul %8, %10, %cst_11 {dimension_numbers = #tpu.dot_dimension_numbers<[1], [0], [0], [1], [0, 0, 1, 1], [], []>} : vector<16x192xf32>, vector<192x128xf32>, vector<16x128xf32> -> vector<16x128xf32>
    %12 = arith.addf %6, %11 : vector<16x128xf32>
    %c0_12 = arith.constant 0 : index
    %c2 = arith.constant 2 : index
    %c0_13 = arith.constant 0 : index
    %13 = vector.load %arg1[%c0_12, %c2, %c0_13] : memref<1x18x192xf32, #tpu.memory_space<vmem>>, vector<1x16x192xf32>
    %14 = vector.shape_cast %13 : vector<1x16x192xf32> to vector<16x192xf32>
    %c2_14 = arith.constant 2 : index
    %c0_15 = arith.constant 0 : index
    %c0_16 = arith.constant 0 : index
    %15 = vector.load %arg2[%c2_14, %c0_15, %c0_16] : memref<3x192x128xf32, #tpu.memory_space<vmem>>, vector<1x192x128xf32>
    %16 = vector.shape_cast %15 : vector<1x192x128xf32> to vector<192x128xf32>
    %cst_17 = arith.constant dense<0.000000e+00> : vector<16x128xf32>
    %17 = tpu.matmul %14, %16, %cst_17 {dimension_numbers = #tpu.dot_dimension_numbers<[1], [0], [0], [1], [0, 0, 1, 1], [], []>} : vector<16x192xf32>, vector<192x128xf32>, vector<16x128xf32> -> vector<16x128xf32>
    %18 = arith.addf %12, %17 : vector<16x128xf32>
    %c0_18 = arith.constant 0 : index
    %c0_19 = arith.constant 0 : index
    %19 = vector.load %arg3[%c0_18, %c0_19] : memref<1x128xf32, #tpu.memory_space<vmem>>, vector<1x128xf32>
    %20 = vector.broadcast %19 : vector<1x128xf32> to vector<16x128xf32>
    %21 = arith.addf %18, %20 : vector<16x128xf32>
    %c0_20 = arith.constant 0 : index
    %c0_21 = arith.constant 0 : index
    %c0_22 = arith.constant 0 : index
    %22 = vector.load %arg4[%c0_20, %c0_21, %c0_22] : memref<1x16x128xf32, #tpu.memory_space<vmem>>, vector<1x16x128xf32>
    %23 = vector.shape_cast %22 : vector<1x16x128xf32> to vector<16x128xf32>
    %24 = vector.shape_cast %21 : vector<16x128xf32> to vector<1x16x128xf32>
    tpu.vector_store %arg4[%c0_20, %c0_21, %c0_22], %24 {strides = array<i32>} : memref<1x16x128xf32, #tpu.memory_space<vmem>>, vector<1x16x128xf32>,
    return
  }
  func.func @transform_0(%arg0: i32) -> (i32, i32, i32) {
    %c0_i32 = arith.constant 0 : i32
    %c0_i32_0 = arith.constant 0 : i32
    %c0_i32_1 = arith.constant 0 : i32
    return %arg0, %c0_i32, %c0_i32_0 : i32, i32, i32
  }
  func.func @transform_1(%arg0: i32) -> (i32, i32, i32) {
    %c0_i32 = arith.constant 0 : i32
    %c0_i32_0 = arith.constant 0 : i32
    %c0_i32_1 = arith.constant 0 : i32
    %c0_i32_2 = arith.constant 0 : i32
    return %c0_i32, %c0_i32_0, %c0_i32_1 : i32, i32, i32
  }
  func.func @transform_2(%arg0: i32) -> (i32, i32) {
    %c0_i32 = arith.constant 0 : i32
    %c0_i32_0 = arith.constant 0 : i32
    %c0_i32_1 = arith.constant 0 : i32
    return %c0_i32, %c0_i32_0 : i32, i32
  }
  func.func @transform_3(%arg0: i32) -> (i32, i32, i32) {
    %c0_i32 = arith.constant 0 : i32
    %c0_i32_0 = arith.constant 0 : i32
    %c0_i32_1 = arith.constant 0 : i32
    return %arg0, %c0_i32, %c0_i32_0 : i32, i32, i32
  }
}

</mosaic_0001>

<bundles_post_ra>
// kernel: tpu_custom_call.1
= control target key start
LH: loop header
LB: loop body
LE: loop exit
PB: predicated region body
PF: predicated region fallthrough
CT: control target
= control target key end

     0   :  { %8 = vsyncpa [#allocation3], 0  ;;  %s900_s0 = inlined_call_operand.vmem [shape: f32[2,18,192], index: 0, kind: input, shape index: {}]   ;;  %s901_s1 = inlined_call_operand.hbm [shape: f32[3,192,128], index: 1, kind: input, shape index: {}]   ;;  %s902_s2 = inlined_call_operand.vmem [shape: f32[1,128], index: 2, kind: input, shape index: {}]   ;;  %s903_s3 = inlined_call_operand.hbm [shape: f32[2,16,128], index: 3, kind: output, shape index: {}]  }
   0x1   :  { %9 = vsyncpa [#allocation4], 0 }
   0x2   :  { %11 = vsyncpa [#allocation4 + $0x1], 0  ;;  %s759_s12 = smov 0   ;;  %s761_s13 = smov 0  }
   0x3   :  { %s763_s14 = smov 0   ;;  %s765_s15 = smov 0  }
   0x4 LB: > { %s780_s16 = sadd.s32 4294967295, %s732_s15   ;;  %s560_s17 = sadd.s32 4294967294, %s732_s15   ;;  %s732_s15 = sphi %s765_s15, %s909_s15   ;;  %s728_s14 = sphi %s763_s14, %s908_s14   ;;  %s724_s13 = sphi %s761_s13, %s907_s13   ;;  %s720_s12 = sphi %s759_s12, %s906_s12  }
   0x5   : > { %s784_s18 = sadd.s32 1, %s732_s15   ;;  %s92_s19 = sadd.s32 1, %s728_s14 }
   0x6   : > { %s89_s20 = ssub.s32 %s732_s15, %s784_s18  ;;  %p102_p0 = scmp.ne.s32.totalorder %s728_s14, %s724_s13 }
   0x7   : > { %p90_p1 = scmp.eq.s32.totalorder %s89_s20, 0  ;;  %p103_p2 = scmp.eq.s32.totalorder %s780_s16, 1 }
   0x8   : > { %p108_p3 = scmp.ne.s32.totalorder %s724_s13, %s720_s12  ;;  %p109_p4 = scmp.eq.s32.totalorder %s560_s17, 1 }
   0x9   : > { %s795_s21 = scalar_select %p90_p1, %s728_s14, %s92_s19  }
   0xa   : > { %p797_p5 = por %p103_p2, %p102_p0  ;;  %p801_p6 = por %p109_p4, %p108_p3 }
   0xb   : > { %p561_p7 = scmp.ge.s32.totalorder %s732_s15, 1  ;;  %p116_p8 = scmp.lt.s32.totalorder %s732_s15, 3 }
   0xc   : > { %p595_p9 = scmp.eq.s32.totalorder %s780_s16, 0  ;;  %s127_s26 = sshll.u32 %s901_s1, 4  ;;  %s128_s26 = int_to_ptr.hbm [resolvable:$true] %s127_s26 }
   0xd   : > { %p117_p10 = pnand %p561_p7, %p116_p8  ;;  %s734_s27 = smov [#allocation2]  }
   0xe   : > { %s129_s28 = sshll.u32 %s734_s27, 4  ;;  %s735_s29 = smov 128   ;;  %s130_s28 = int_to_ptr.vmem [resolvable:$true] %s129_s28 }
   0xf   : > { %p587_p11 = pneg %p117_p10  ;;  %s736_s30 = smov 8  }
  0x10   : > { %156 = sbr.rel (%p117_p10) target bundleno = 215 (0xd7), region = 32 }
  0x11   : > { %p588_p12 = pnand %p595_p9, %p587_p11 }
  0x13   : > { %590 = dma.hbm_to_vmem [thread:$0]  (!%p588_p12), %s128_s26, 9216, %s130_s28, [#allocation3], %s735_s29, %s735_s29, %s736_s30  }
  0x15   : > { %711 = dma.done.wait (%p595_p9), [#allocation3], 9216  }
  0x16   : > { %713 = vsyncadd (%p595_p9), [#allocation3], 4294958080  ;;  %v234_v0 = vld [vmem:[#allocation2 + $0x138] sm:$0xff]  ;;  %v233_v3 = vld [vmem:[#allocation2 + $0x130] sm:$0xff]  ;;  %p181_p13 = scmp.lt.s32.totalorder %s780_s16, 1  ;;  %vm262_vm0 = vcmask 523264  }
  0x17   : > { %v242_v1 = vld [vmem:[#allocation2 + $0x178] sm:$0xff]  ;;  %267 = vmatpush.msra.mxu0 %v234_v0  ;;  %v241_v4 = vld [vmem:[#allocation2 + $0x170] sm:$0xff]  ;;  %v232_v6 = vld [vmem:[#allocation2 + $0x128] sm:$0xff]  ;;  %vm249_vm1 = vcmask 1046528   ;;  %vm397_vm2 = vcmask 1045504   ;;  %s178_s9 = sand.u32 1, %s724_s13  }
  0x18   : > { %v205_v2 = vld [vmem:[#allocation2 + $0x78] sm:$0xff]  ;;  %298 = vmatpush.msra.mxu1 %v242_v1  ;;  %v204_v5 = vld [vmem:[#allocation2 + $0x70] sm:$0xff]  ;;  %v240_v7 = vld [vmem:[#allocation2 + $0x168] sm:$0xff]  ;;  %s821_s4 = scalar_select %p181_p13, %s780_s16, 1 }
  0x19   : > { %318 = vmatpush.msra.mxu2 %v205_v2  ;;  %268 = vmatpush.msra.mxu0 %v233_v3  ;;  %v203_v8 = vld [vmem:[#allocation2 + $0x68] sm:$0xff]  ;;  %v231_v9 = vld [vmem:[#allocation2 + $0x120] sm:$0xff]  ;;  %v213_v12 = vld [vmem:[#allocation2 + $0xb8] sm:$0xff]  ;;  %s566_s10 = sshll.u32 %s178_s9, 4  ;;  %s579_s19 = sshll.u32 %s780_s16, 4 }
  0x1a   : > { %299 = vmatpush.msra.mxu1 %v241_v4  ;;  %v239_v10 = vld [vmem:[#allocation2 + $0x160] sm:$0xff]  ;;  %v230_v13 = vld [vmem:[#allocation2 + $0x118] sm:$0xff]  ;;  %349 = vmatpush.msra.mxu3 %v213_v12  ;;  %v212_v15 = vld [vmem:[#allocation2 + $0xb0] sm:$0xff]  ;;  %s580_s5 = smul.u32 48, %s821_s4  ;;  %s482_s25 = scalar_lea.hbm %s903_s3, %s579_s19 }
  0x1b   : > { %319 = vmatpush.msra.mxu2 %v204_v5  ;;  %269 = vmatpush.msra.mxu0 %v232_v6  ;;  %v202_v11 = vld [vmem:[#allocation2 + $0x60] sm:$0xff]  ;;  %v238_v14 = vld [vmem:[#allocation2 + $0x158] sm:$0xff]  ;;  %v211_v17 = vld [vmem:[#allocation2 + $0xa8] sm:$0xff]  ;;  %s180_s26 = scalar_lea.vmem [#allocation5], %s566_s10  ;;  %s485_s28 = sshll.u32 %s482_s25, 4  ;;  %s486_s28 = int_to_ptr.hbm [resolvable:$true] %s485_s28 }
  0x1c   : > { %300 = vmatpush.msra.mxu1 %v240_v7  ;;  %v201_v16 = vld [vmem:[#allocation2 + $0x58] sm:$0xff]  ;;  %v229_v18 = vld [vmem:[#allocation2 + $0x110] sm:$0xff]  ;;  %350 = vmatpush.msra.mxu3 %v212_v15  ;;  %v210_v21 = vld [vmem:[#allocation2 + $0xa0] sm:$0xff]  ;;  %s827_s8 = scalar_lea.vmem %s900_s0, %s580_s5  ;;  %s483_s27 = sshll.u32 %s180_s26, 4  ;;  %s484_s27 = int_to_ptr.vmem [resolvable:$true] %s483_s27 }
  0x1d   : > { %320 = vmatpush.msra.mxu2 %v203_v8  ;;  %270 = vmatpush.msra.mxu0 %v231_v9  ;;  %v237_v19 = vld [vmem:[#allocation2 + $0x150] sm:$0xff]  ;;  %v228_v22 = vld [vmem:[#allocation2 + $0x108] sm:$0xff]  ;;  %v209_v25 = vld [vmem:[#allocation2 + $0x98] sm:$0xff]  ;;  %s471_s16 = scalar_lea.sflag [#allocation4], %s178_s9  ;;  %s680_s29 = sshra.s32 %s486_s28, 4  ;;  %s681_s29 = int_to_ptr.hbm [resolvable:$true] %s680_s29 }
  0x1e   : > { %301 = vmatpush.msra.mxu1 %v239_v10  ;;  %v200_v20 = vld [vmem:[#allocation2 + $0x50] sm:$0xff]  ;;  %v236_v23 = vld [vmem:[#allocation2 + $0x148] sm:$0xff]  ;;  %351 = vmatpush.msra.mxu3 %v211_v17  ;;  %v227_v26 = vld [vmem:[#allocation2 + $0x100] sm:$0xff]  ;;  %s682_s30 = scalar_lea.hbm %s681_s29, 16  ;;  %s686_s6 = scalar_lea.hbm %s903_s3, 32 }
  0x1f   : > { %321 = vmatpush.msra.mxu2 %v202_v11  ;;  %271 = vmatpush.msra.mxu0 %v230_v13  ;;  %v199_v24 = vld [vmem:[#allocation2 + $0x48] sm:$0xff]  ;;  %v235_v27 = vld [vmem:[#allocation2 + $0x140] sm:$0xff]  ;;  %v384_v29 = vld [vmem:[#allocation2 + $0x1f8] sm:$0xff]  ;;  %p683_p0 = scmp.ne.s32.totalorder %s681_s29, %s682_s30  ;;  %p687_p3 = scmp.lt.s32.totalorder %s681_s29, %s903_s3 }
  0x20   : > { %302 = vmatpush.msra.mxu1 %v238_v14  ;;  %352 = vmatpush.msra.mxu3 %v210_v21  ;;  %v198_v28 = vld [vmem:[#allocation2 + $0x40] sm:$0xff]  ;;  %v226_v30 = vld [vmem:[#allocation2 + $0xf8] sm:$0xff]  ;;  %v208_v31 = vld [vmem:[#allocation2 + $0x90] sm:$0xff]  ;;  %p688_p4 = scmp.lt.s32.totalorder %s686_s6, %s682_s30 }
  0x21   : > { %322 = vmatpush.msra.mxu2 %v201_v16  ;;  %272 = vmatpush.msra.mxu0 %v229_v18  ;;  %v197_v32 = vld [vmem:[#allocation2 + $0x38] sm:$0xff]  ;;  %v383_v33 = vld [vmem:[#allocation2 + $0x1f0] sm:$0xff]  ;;  %v207_v35 = vld [vmem:[#allocation2 + $0x88] sm:$0xff]  ;;  %p684_p1 = pnand %p683_p0, %p797_p5 }
  0x22   : > { %303 = vmatpush.msra.mxu1 %v237_v19  ;;  %353 = vmatpush.msra.mxu3 %v209_v25  ;;  %v225_v34 = vld [vmem:[#allocation2 + $0xf0] sm:$0xff]  ;;  %v382_v37 = vld [vmem:[#allocation2 + $0x1e8] sm:$0xff]  ;;  %v206_v39 = vld [vmem:[#allocation2 + $0x80] sm:$0xff]  ;;  %p689_p7 = por %p688_p4, %p687_p3 }
  0x23   : > { %323 = vmatpush.msra.mxu2 %v200_v20  ;;  %273 = vmatpush.msra.mxu0 %v228_v22  ;;  %v196_v36 = vld [vmem:[#allocation2 + $0x30] sm:$0xff]  ;;  %v224_v38 = vld [vmem:[#allocation2 + $0xe8] sm:$0xff]  ;;  %v381_v41 = vld [vmem:[#allocation2 + $0x1e0] sm:$0xff]  ;;  %p685_p2 = pneg %p684_p1 }
  0x24   : > { %304 = vmatpush.msra.mxu1 %v236_v23  ;;  %354 = vmatpush.msra.mxu3 %v208_v31  ;;  %v195_v40 = vld [vmem:[#allocation2 + $0x28] sm:$0xff]  ;;  %v223_v42 = vld [vmem:[#allocation2 + $0xe0] sm:$0xff]  ;;  %v380_v45 = vld [vmem:[#allocation2 + $0x1d8] sm:$0xff] }
  0x25   : > { %324 = vmatpush.msra.mxu2 %v199_v24  ;;  %274 = vmatpush.msra.mxu0 %v227_v26  ;;  %v194_v43 = vld [vmem:[#allocation2 + $0x20] sm:$0xff]  ;;  %v187_v44 = vld [vmem:[%s827_s8 + $0x8] sm:$0xff]  ;;  %v831_v46 = vld [vmem:[%s827_s8 + $0x18] sm:$0xff]  ;;  %p690_p8 = pnand %p689_p7, %p685_p2 }
  0x26   : > { %305 = vmatpush.msra.mxu1 %v235_v27  ;;  %355 = vmatpush.msra.mxu3 %v207_v35  ;;  %v215_v47 = vld [vmem:[%s827_s8 + $0x8] sm:$0xfe]  ;;  %v222_v48 = vld [vmem:[#allocation2 + $0xd8] sm:$0xff]  ;;  %v379_v51 = vld [vmem:[#allocation2 + $0x1d0] sm:$0xff]  ;;  %v254_v57 = vrot.slane %v831_v46, 1  ;;  %v402_v21 = vrot.slane %v831_v46, 2 }
  0x27   : > { %325 = vmatpush.msra.mxu2 %v198_v28  ;;  %275 = vmatpush.msra.mxu0 %v226_v30  ;;  %v193_v49 = vld [vmem:[#allocation2 + $0x18] sm:$0xff]  ;;  %v836_v52 = vld [vmem:[%s827_s8 + $0x10] sm:$0xff]  ;;  %v214_v53 = vld [vmem:[%s827_s8] sm:$0xfe]  ;;  %v253_v56 = vrot.slane %v215_v47, 1 }
  0x28   : > { %414 = vmatpush.msrb.mxu1 %v384_v29  ;;  %356 = vmatpush.msra.mxu3 %v206_v39  ;;  %v392_v50 = vld [vmem:[#allocation2 + $0x238] sm:$0xff]  ;;  %v221_v54 = vld [vmem:[#allocation2 + $0xd0] sm:$0xff]  ;;  %v378_v59 = vld [vmem:[#allocation2 + $0x1c8] sm:$0xff]  ;;  %v250_v62 = vrot.slane %v214_v53, 1  ;;  %v251_v63 = vrot.slane %v836_v52, 1  ;;  %v399_v31 = vrot.slane %v836_v52, 2 }
  0x29   : > { %326 = vmatpush.msra.mxu2 %v197_v32  ;;  %276 = vmatpush.msra.mxu0 %v225_v34  ;;  %v391_v55 = vld [vmem:[#allocation2 + $0x230] sm:$0xff]  ;;  %v220_v60 = vld [vmem:[#allocation2 + $0xc8] sm:$0xff]  ;;  %v377_v1 = vld [vmem:[#allocation2 + $0x1c0] sm:$0xff]  ;;  %v255_v3 = vsel %vm249_vm1, %v253_v56, %v254_v57 }
  0x2a   : > { %415 = vmatpush.msrb.mxu1 %v383_v33  ;;  %570 = vmatmul.msk.f32.vlgmr.msra.gmra.mxu3 %vm262_vm0, %v187_v44  ;;  %v192_v58 = vld [vmem:[#allocation2 + $0x10] sm:$0xff]  ;;  %v390_v61 = vld [vmem:[#allocation2 + $0x228] sm:$0xff]  ;;  %v219_v2 = vld [vmem:[#allocation2 + $0xc0] sm:$0xff]  ;;  %v252_v7 = vsel %vm249_vm1, %v250_v62, %v251_v63 }
  0x2b   : > { %327 = vmatpush.msra.mxu2 %v196_v36  ;;  %277 = vmatpush.msra.mxu0 %v224_v38  ;;  %v191_v0 = vld [vmem:[#allocation2 + $0x8] sm:$0xff]  ;;  %v190_v4 = vld [vmem:[#allocation2] sm:$0xff]  ;;  %v376_v9 = vld [vmem:[#allocation2 + $0x1b8] sm:$0xff] }
  0x2c   : > { %416 = vmatpush.msrb.mxu1 %v382_v37  ;;  %445 = vmatpush.msrb.mxu3 %v392_v50  ;;  %v389_v5 = vld [vmem:[#allocation2 + $0x220] sm:$0xff]  ;;  %v217_v6 = vld [vmem:[%s827_s8 + $0x28] sm:$0x1]  ;;  %v388_v11 = vld [vmem:[#allocation2 + $0x218] sm:$0xff] }
  0x2d   : > { %328 = vmatpush.msra.mxu2 %v195_v40  ;;  %278 = vmatpush.msra.mxu0 %v223_v42  ;;  %v186_v8 = vld [vmem:[%s827_s8] sm:$0xff]  ;;  %v258_v12 = vrot.slane %v217_v6, 1  ;;  %v375_v13 = vld [vmem:[#allocation2 + $0x1b0] sm:$0xff]  ;;  %v365_v14 = vld [vmem:[%s827_s8 + $0x8] sm:$0xfc] }
  0x2e   : > { %417 = vmatpush.msrb.mxu1 %v381_v41  ;;  %446 = vmatpush.msrb.mxu3 %v391_v55  ;;  %v216_v10 = vld [vmem:[%s827_s8 + $0x20] sm:$0x1]  ;;  %v387_v15 = vld [vmem:[#allocation2 + $0x210] sm:$0xff]  ;;  %v374_v17 = vld [vmem:[#allocation2 + $0x1a8] sm:$0xff]  ;;  %v401_v20 = vrot.slane %v365_v14, 2 }
  0x2f   : > { %329 = vmatpush.msra.mxu2 %v194_v43  ;;  %279 = vmatpush.msra.mxu0 %v222_v48  ;;  %v256_v16 = vrot.slane %v216_v10, 1  ;;  %v386_v18 = vld [vmem:[#allocation2 + $0x208] sm:$0xff]  ;;  %v259_v19 = vsel %vm249_vm1, %v254_v57, %v258_v12  ;;  %v373_v22 = vld [vmem:[#allocation2 + $0x1a0] sm:$0xff]  ;;  %v372_v25 = vld [vmem:[#allocation2 + $0x198] sm:$0xff] }
  0x30   : > { %418 = vmatpush.msrb.mxu1 %v380_v45  ;;  %447 = vmatpush.msrb.mxu3 %v390_v61  ;;  %v385_v23 = vld [vmem:[#allocation2 + $0x200] sm:$0xff]  ;;  %v403_v27 = vsel %vm397_vm2, %v401_v20, %v402_v21  ;;  %v371_v28 = vld [vmem:[#allocation2 + $0x190] sm:$0xff]  ;;  %v367_v29 = vld [vmem:[%s827_s8 + $0x28] sm:$0x3] }
  0x31   : > { %330 = vmatpush.msra.mxu2 %v193_v49  ;;  %280 = vmatpush.msra.mxu0 %v221_v54  ;;  %v257_v24 = vsel %vm249_vm1, %v251_v63, %v256_v16  ;;  %v364_v26 = vld [vmem:[%s827_s8] sm:$0xfc]  ;;  %v370_v32 = vld [vmem:[#allocation2 + $0x188] sm:$0xff]  ;;  %v406_v33 = vrot.slane %v367_v29, 2  ;;  %v366_v36 = vld [vmem:[%s827_s8 + $0x20] sm:$0x3] }
  0x32   : > { %419 = vmatpush.msrb.mxu1 %v379_v51  ;;  %448 = vmatpush.msrb.mxu3 %v389_v5  ;;  %v398_v30 = vrot.slane %v364_v26, 2  ;;  %v369_v34 = vld [vmem:[#allocation2 + $0x180] sm:$0xff]  ;;  %v404_v38 = vrot.slane %v366_v36, 2 }
  0x33   : > { %331 = vmatpush.msra.mxu2 %v192_v58  ;;  %281 = vmatpush.msra.mxu0 %v220_v60  ;;  %v407_v37 = vsel %vm397_vm2, %v402_v21, %v406_v33  ;;  %v635_v53 = vld [vmem:[%s902_s2] ss:$0 sm:$0xff] }
  0x34   : > { %420 = vmatpush.msrb.mxu1 %v378_v59  ;;  %571 = vmatmul.msk.f32.gmra.mxu3 %vm262_vm0, %v831_v46  ;;  %v400_v35 = vsel %vm397_vm2, %v398_v30, %v399_v31  ;;  %v405_v39 = vsel %vm397_vm2, %v399_v31, %v404_v38 }
  0x35   : > { %332 = vmatpush.msra.mxu2 %v191_v0  ;;  %282 = vmatpush.msra.mxu0 %v219_v2 }
  0x36   : > { %421 = vmatpush.msrb.mxu1 %v377_v1  ;;  %283 = vmatmul.f32.vlgmr.msra.gmra.mxu0 %v252_v7 }
  0x37   : > { %568 = vmatmul.msk.f32.vlgmr.msra.gmra.mxu1 %vm262_vm0, %v255_v3  ;;  %333 = vmatpush.msra.mxu2 %v190_v4 }
  0x38   : > { %334 = vmatmul.f32.vlgmr.msra.gmra.mxu2 %v186_v8  ;;  %422 = vmatpush.msrb.mxu1 %v376_v9 }
  0x39   : > { %449 = vmatpush.msrb.mxu3 %v388_v11 }
  0x3a   : > { %423 = vmatpush.msrb.mxu1 %v375_v13 }
  0x3b   : > { %450 = vmatpush.msrb.mxu3 %v387_v15 }
  0x3c   : > { %424 = vmatpush.msrb.mxu1 %v374_v17 }
  0x3d   : > { %451 = vmatpush.msrb.mxu3 %v386_v18 }
  0x3e   : > { %425 = vmatpush.msrb.mxu1 %v373_v22  ;;  %286 = vmatmul.f32.gmra.mxu0 %v257_v24 }
  0x3f   : > { %569 = vmatmul.msk.f32.gmra.mxu1 %vm262_vm0, %v259_v19  ;;  %452 = vmatpush.msrb.mxu3 %v385_v23 }
  0x40   : > { %337 = vmatmul.f32.gmra.mxu2 %v836_v52  ;;  %426 = vmatpush.msrb.mxu1 %v372_v25 }
  0x41   : > { %572 = vmatmul.msk.f32.vlgmr.msrb.gmra.mxu3 %vm262_vm0, %v403_v27 }
  0x42   : > { %427 = vmatpush.msrb.mxu1 %v371_v28 }
  0x44   : > { %428 = vmatpush.msrb.mxu1 %v370_v32 }
  0x46   : > { %429 = vmatpush.msrb.mxu1 %v369_v34 }
  0x47   : > { %430 = vmatmul.f32.vlgmr.msrb.gmra.mxu1 %v400_v35 }
  0x49   : > { %573 = vmatmul.msk.f32.gmra.mxu3 %vm262_vm0, %v407_v37 }
  0x4f   : > { %433 = vmatmul.f32.gmra.mxu1 %v405_v39 }
  0xad   : > { %v358_v40 = vpop.f32.mrf.mxu3 }
  0xb3   : > { %v284_v42 = vpop.f32.mrf.mxu0 }
  0xb4   : > { %v307_v41 = vpop.f32.mrf.mxu1 }
  0xb5   : > { %v308_v46 = vadd.f32 %v307_v41, %v284_v42 }
  0xb7   : > { %v361_v44 = vpop.f32.mrf.mxu3 }
  0xbb   : > { %v335_v45 = vpop.f32.mrf.mxu2  ;;  %v287_v48 = vpop.f32.mrf.mxu0 }
  0xbc   : > { %v310_v43 = vpop.f32.mrf.mxu1  ;;  %v336_v47 = vadd.f32 %v335_v45, %v308_v46 }
  0xbd   : > { %v311_v55 = vadd.f32 %v310_v43, %v287_v48 }
  0xbe   : > { %v359_v51 = vadd.f32 %v358_v40, %v336_v47 }
  0xc3   : > { %v338_v54 = vpop.f32.mrf.mxu2 }
  0xc4   : > { %v431_v49 = vpop.f32.mrf.mxu1  ;;  %v454_v50 = vpop.f32.mrf.mxu3  ;;  %v339_v57 = vadd.f32 %v338_v54, %v311_v55 }
  0xc5   : > { %v455_v52 = vadd.f32 %v454_v50, %v431_v49 }
  0xc6   : > { %v362_v61 = vadd.f32 %v361_v44, %v339_v57 }
  0xc7   : > { %v460_v56 = vadd.f32 %v455_v52, %v359_v51 }
  0xc9   : > { %v466_v58 = vadd.f32 %v635_v53, %v460_v56 }
  0xcb   : > { %468 = vst [vmem:[%s180_s26] sm:$0xff] %v466_v58 }
  0xcc   : > { %v434_v59 = vpop.f32.mrf.mxu1  ;;  %v457_v60 = vpop.f32.mrf.mxu3 }
  0xcd   : > { %v458_v62 = vadd.f32 %v457_v60, %v434_v59 }
  0xcf   : > { %v461_v63 = vadd.f32 %v458_v62, %v362_v61 }
  0xd1   : > { %v467_v0 = vadd.f32 %v635_v53, %v461_v63 }
  0xd3   : > { %469 = vst [vmem:[%s180_s26 + $0x8] sm:$0xff] %v467_v0 }
  0xd4   : > { %693 = shalt.err (!%p690_p8)
}
  0xd5   : > { %s737_s9 = smov 128   ;;  %s738_s10 = smov 8  }
  0xd6   : > { %585 = dma.vmem_to_hbm [thread:$0]  (%p797_p5), %s484_s27, 256, %s486_s28, %s471_s16, %s737_s9, %s737_s9, %s738_s10  }
  0xd7 PF: > { %p597_p9 = scmp.ge.s32.totalorder %s732_s15, 2  ;;  %s500_s11 = sand.u32 1, %s720_s12  }
  0xd8   : > { %s501_s17 = scalar_lea.sflag [#allocation4], %s500_s11 }
  0xd9   : > { %p592_p10 = pnand %p597_p9, %p801_p6 }
  0xdb   : > { %p593_p11 = pneg %p592_p10 }
  0xdd   : > { %715 = dma.done.wait (%p593_p11), %s501_s17, 256  }
  0xde   : > { %717 = vsyncadd (%p593_p11), %s501_s17, 4294967040  ;;  %p14_p12 = scmp.ge.s32.totalorder %s784_s18, 4   ;;  %s906_s12 = smov %s724_s13 }
  0xdf   : > { %s907_s13 = smov %s728_s14  ;;  %s908_s14 = smov %s795_s21 }
  0xe0   : > { %s909_s15 = smov %s784_s18  ;;  %16 = sbr.rel (!%p14_p12) target bundleno = 4 (0x4), region = 74 }
  0xe5   :  { %507 = vsyncpa [#allocation3], 1 }
  0xe6   :  { %509 = vsyncpa [#allocation3 + $0x1], 1 }
  0xe7   :  { %510 = vsyncpa [#allocation4], 1 }
  0xe8   :  { %512 = vsyncpa [#allocation4 + $0x1], 1 }

</bundles_post_ra>
